<compile_context>
chip_gen: v6e
topology: v6e:2x2x1
jax: 0.10.0
libtpu: 0.0.40
codegen_flags: <defaults>
</compile_context>

<pallas_src>
import functools
import math

import numpy as np

import jax
import jax.numpy as jnp
from jax.experimental import pallas as pl
from jax.experimental.pallas import tpu as pltpu

_LANE = 128
_SUBLANE = 8


def _round_up(x, m):
    return ((x + m - 1) // m) * m


def _vmem_cap_bytes():
    """Generation-aware VMEM ceiling (85% of physical), with a safe fallback."""
    try:
        return int(0.85 * pltpu.get_tpu_info().vmem_capacity_bytes)
    except Exception:
        return 64 * 1024 * 1024


# --------------------------------------------------------------------------
# Fused MLP kernel: x -> [Linear (+ ReLU)] * L -> out, all inside one grid step.
# --------------------------------------------------------------------------
def _make_mlp_kernel(num_layers, compute_dtype):
    def kernel(*refs):
        x_ref = refs[0]
        o_ref = refs[-1]
        wb = refs[1:-1]                       # w0, b0, w1, b1, ...

        h = x_ref[...]                        # (tm, K_pad) already compute_dtype
        for i in range(num_layers):
            w_ref = wb[2 * i]                 # (K_i, N_i)  compute_dtype
            b_ref = wb[2 * i + 1]             # (1,  N_i)   f32
            # MXU matmul in bf16 with f32 accumulation.
            y = jnp.dot(h, w_ref[...], preferred_element_type=jnp.float32)
            y = y + b_ref[...]                # f32 epilogue: bias
            if i < num_layers - 1:
                y = jnp.maximum(y, 0.0)       # f32 epilogue: ReLU
                h = y.astype(compute_dtype)   # stays in vregs/VMEM
            else:
                o_ref[...] = y.astype(o_ref.dtype)

    return kernel


# --------------------------------------------------------------------------
# Parameter init (matches the PyTorch Linear shapes) and ONE-TIME prep.
# --------------------------------------------------------------------------
def init_projection_head_params(key, input_dim, hidden_dim, output_dim, num_layers):
    """Returns list of (weight (out,in), bias (out,)) per Linear layer."""
    dims = [input_dim] + [hidden_dim] * (num_layers - 1) + [output_dim]
    params = []
    for i in range(len(dims) - 1):
        fan_in, fan_out = dims[i], dims[i + 1]
        key, kw, kb = jax.random.split(key, 3)
        bound = 1.0 / math.sqrt(fan_in)
        w = jax.random.uniform(kw, (fan_out, fan_in), jnp.float32, -bound, bound)
        b = jax.random.uniform(kb, (fan_out,), jnp.float32, -bound, bound)
        params.append((w, b))
    return params


def prepare_projection_head_params(params, compute_dtype=jnp.bfloat16):
    """One-time prep (NOT per forward):
      * transpose weights to (in, out),
      * zero-pad K (incl. the first layer's in_dim) and N to multiples of 128,
      * cast weights to compute_dtype (bf16), keep biases f32 as (1, N_pad).
    Zero-padding is exact: padded rows/columns contribute exactly zero through
    matmul, bias-add (padded bias = 0) and ReLU, and are sliced off at the end.
    """
    in_dim = params[0][0].shape[1]
    in_pad = _round_up(in_dim, _LANE)
    prepped = []
    prev = in_pad
    for (w, b) in params:
        out_dim = w.shape[0]
        out_pad = _round_up(out_dim, _LANE)
        w_t = jnp.transpose(w)                                    # (in, out)
        w_t = jnp.pad(w_t, ((0, prev - w_t.shape[0]), (0, out_pad - out_dim)))
        b_p = jnp.pad(b, (0, out_pad - out_dim)).reshape(1, out_pad)
        prepped.append((w_t.astype(compute_dtype), b_p.astype(jnp.float32)))
        prev = out_pad
    meta = {
        "in_dim": in_dim,
        "in_pad": in_pad,
        "out_dim": params[-1][0].shape[0],
        "compute_dtype": compute_dtype,
    }
    return prepped, meta


# --------------------------------------------------------------------------
# Fused forward: single pallas_call for the whole MLP.
# --------------------------------------------------------------------------
def projection_head_forward(x, prepped, meta, *, tm_target=256,
                            out_dtype=jnp.float32, single_buffer_weights=True):
    M, K = x.shape
    assert K == meta["in_dim"], "feature dim mismatch"
    compute_dtype = meta["compute_dtype"]
    in_pad = meta["in_pad"]
    num_layers = len(prepped)
    out_dim = meta["out_dim"]
    out_pad = prepped[-1][1].shape[1]
    out_itemsize = np.dtype(out_dtype).itemsize
    act_itemsize = np.dtype(compute_dtype).itemsize

    # Adaptive batch tiling: minimise padding while keeping ~tm_target-row tiles,
    # and split into >=2 blocks when M permits so v7x's second TensorCore gets
    # work and the x DMA pipelines on all chips.
    n_tiles = max(1, pl.cdiv(M, tm_target))
    if n_tiles == 1 and M >= 2 * _SUBLANE:
        n_tiles = 2
    tm = _round_up(pl.cdiv(M, n_tiles), _SUBLANE)
    m_pad = _round_up(M, tm)
    grid_m = m_pad // tm

    # Per-call input prep: cast to bf16, zero-pad batch -> m_pad and K -> in_pad.
    x_p = x.astype(compute_dtype)
    if (m_pad != M) or (in_pad != K):
        x_p = jnp.pad(x_p, ((0, m_pad - M), (0, in_pad - K)))

    kernel = _make_mlp_kernel(num_layers, compute_dtype)

    # Resident (constant index_map) specs: single-buffered -- double-buffering a
    # constant block just duplicates it in VMEM for zero benefit.
    def _resident_spec(shape):
        if single_buffer_weights:
            return pl.BlockSpec(shape, lambda i: (0, 0),
                                pipeline_mode=pl.Buffered(1))
        return pl.BlockSpec(shape, lambda i: (0, 0))

    # x spec: deeper buffering only when the per-step MXU work is thin relative
    # to the x fetch (shallow nets with a large contraction dim).
    if num_layers <= 2 and in_pad >= 1024:
        x_spec = pl.BlockSpec((tm, in_pad), lambda i: (i, 0),
                              pipeline_mode=pl.Buffered(3))
    else:
        x_spec = pl.BlockSpec((tm, in_pad), lambda i: (i, 0))

    in_specs = [x_spec]
    flat_args = [x_p]
    flops = 0
    weight_hbm_bytes = 0
    resident_vmem_bytes = 0
    nbuf = 1 if single_buffer_weights else 2
    for (w_t, b_p) in prepped:
        kk, nn = w_t.shape
        in_specs.append(_resident_spec((kk, nn)))
        in_specs.append(_resident_spec((1, nn)))
        flat_args += [w_t, b_p]
        flops += 2 * m_pad * kk * nn
        w_bytes = w_t.size * w_t.dtype.itemsize
        weight_hbm_bytes += w_bytes + b_p.size * 4
        resident_vmem_bytes += nbuf * (w_bytes + _SUBLANE * nn * 4)

    out_specs = pl.BlockSpec((tm, out_pad), lambda i: (i, 0))

    bytes_accessed = (x_p.size * act_itemsize + weight_hbm_bytes
                      + m_pad * out_pad * out_itemsize)

    # VMEM budget: double-buffered bf16 x tiles + double-buffered out tiles +
    # resident weights/biases + headroom for live f32 intermediates.
    max_dim = max([in_pad] + [w.shape[1] for (w, _) in prepped])
    vmem_bytes = (2 * tm * in_pad * act_itemsize
                  + 2 * tm * out_pad * out_itemsize
                  + resident_vmem_bytes
                  + 4 * tm * max_dim * 4)
    vmem_limit = int(min(_vmem_cap_bytes(),
                         max(2 * vmem_bytes, 16 * 1024 * 1024)))

    out = pl.pallas_call(
        kernel,
        out_shape=jax.ShapeDtypeStruct((m_pad, out_pad), out_dtype),
        grid_spec=pltpu.PrefetchScalarGridSpec(
            num_scalar_prefetch=0,
            grid=(grid_m,),
            in_specs=in_specs,
            out_specs=out_specs,
        ),
        compiler_params=pltpu.CompilerParams(
            dimension_semantics=("parallel",),
            vmem_limit_bytes=vmem_limit,
        ),
        cost_estimate=pl.CostEstimate(
            flops=flops, transcendentals=0, bytes_accessed=bytes_accessed),
    )(*flat_args)

    # TODO(synk): let callers consume the padded (m_pad, out_pad) buffer / a
    # bf16 output directly to avoid this extra slice pass when out_dim << 128.
    return out[:M, :out_dim]


# --------------------------------------------------------------------------
# Reference (mimics the kernel's bf16-matmul / f32-accumulate numerics).
# --------------------------------------------------------------------------
def reference_forward(x, params, compute_dtype=jnp.bfloat16):
    h = x.astype(compute_dtype)
    n = len(params)
    for i, (w, b) in enumerate(params):
        h = jnp.dot(h, jnp.transpose(w).astype(compute_dtype),
                    preferred_element_type=jnp.float32) + b
        if i < n - 1:
            h = jnp.maximum(h, 0.0).astype(compute_dtype)
    return h


if __name__ == "__main__":
    # Small shapes consistent with the module's forward.
    batch = 8
    input_dim = 32
    hidden_dim = 64
    output_dim = 16
    num_layers = 3

    key = jax.random.PRNGKey(0)
    key, kx = jax.random.split(key)
    x = jax.random.normal(kx, (batch, input_dim), jnp.float32)

    params = init_projection_head_params(
        key, input_dim, hidden_dim, output_dim, num_layers)
    prepped, meta = prepare_projection_head_params(params)   # one-time prep

    def _run(single_buffer):
        fwd = jax.jit(functools.partial(
            projection_head_forward, prepped=prepped, meta=meta,
            single_buffer_weights=single_buffer))
        return jax.block_until_ready(fwd(x))

    try:
        out = _run(True)          # single-buffered resident weights
    except Exception:
        out = _run(False)         # fallback if pl.Buffered(1) is rejected

    ref = reference_forward(x, params)
    assert out.shape == (batch, output_dim)
    assert jnp.allclose(out, ref, atol=1e-3, rtol=1e-3), "mismatch vs reference"

    print("KERNEL_OK")
</pallas_src>

<mosaic_0001>
module attributes {stable_mosaic.version = 11 : i64} {
  func.func @kernel(%arg0: i32, %arg1: memref<8x128xbf16, #tpu.memory_space<vmem>>, %arg2: memref<128x128xbf16, #tpu.memory_space<vmem>>, %arg3: memref<1x128xf32, #tpu.memory_space<vmem>>, %arg4: memref<128x128xbf16, #tpu.memory_space<vmem>>, %arg5: memref<1x128xf32, #tpu.memory_space<vmem>>, %arg6: memref<128x128xbf16, #tpu.memory_space<vmem>>, %arg7: memref<1x128xf32, #tpu.memory_space<vmem>>, %arg8: memref<8x128xf32, #tpu.memory_space<vmem>>) attributes {dimension_semantics = [#tpu.dimension_semantics<parallel>], iteration_bounds = array<i64: 1>, scalar_prefetch = 0 : i64, scratch_operands = 0 : i64, tpu.core_type = #tpu.core_type<tc>, window_params = [{transform_indices = @transform_0, window_bounds = array<i64: 8, 128>}, {pipeline_mode = #tpu.pipeline_mode<synchronous>, transform_indices = @transform_1, window_bounds = array<i64: 128, 128>}, {pipeline_mode = #tpu.pipeline_mode<synchronous>, transform_indices = @transform_2, window_bounds = array<i64: 1, 128>}, {pipeline_mode = #tpu.pipeline_mode<synchronous>, transform_indices = @transform_3, window_bounds = array<i64: 128, 128>}, {pipeline_mode = #tpu.pipeline_mode<synchronous>, transform_indices = @transform_4, window_bounds = array<i64: 1, 128>}, {pipeline_mode = #tpu.pipeline_mode<synchronous>, transform_indices = @transform_5, window_bounds = array<i64: 128, 128>}, {pipeline_mode = #tpu.pipeline_mode<synchronous>, transform_indices = @transform_6, window_bounds = array<i64: 1, 128>}, {transform_indices = @transform_7, window_bounds = array<i64: 8, 128>}]} {
    %c0 = arith.constant 0 : index
    %c0_0 = arith.constant 0 : index
    %0 = vector.load %arg1[%c0, %c0_0] : memref<8x128xbf16, #tpu.memory_space<vmem>>, vector<8x128xbf16>
    %c0_1 = arith.constant 0 : index
    %c0_2 = arith.constant 0 : index
    %1 = vector.load %arg2[%c0_1, %c0_2] : memref<128x128xbf16, #tpu.memory_space<vmem>>, vector<128x128xbf16>
    %cst = arith.constant dense<0.000000e+00> : vector<8x128xf32>
    %2 = tpu.matmul %0, %1, %cst {dimension_numbers = #tpu.dot_dimension_numbers<[1], [0], [0], [1], [0, 0, 1, 1], [], []>} : vector<8x128xbf16>, vector<128x128xbf16>, vector<8x128xf32> -> vector<8x128xf32>
    %c0_3 = arith.constant 0 : index
    %c0_4 = arith.constant 0 : index
    %3 = vector.load %arg3[%c0_3, %c0_4] : memref<1x128xf32, #tpu.memory_space<vmem>>, vector<1x128xf32>
    %4 = vector.broadcast %3 : vector<1x128xf32> to vector<8x128xf32>
    %5 = arith.addf %2, %4 : vector<8x128xf32>
    %cst_5 = arith.constant 0.000000e+00 : f32
    %6 = vector.broadcast %cst_5 : f32 to vector<8x128xf32>
    %7 = arith.maximumf %5, %6 : vector<8x128xf32>
    %8 = arith.truncf %7 : vector<8x128xf32> to vector<8x128xbf16>
    %c0_6 = arith.constant 0 : index
    %c0_7 = arith.constant 0 : index
    %9 = vector.load %arg4[%c0_6, %c0_7] : memref<128x128xbf16, #tpu.memory_space<vmem>>, vector<128x128xbf16>
    %cst_8 = arith.constant dense<0.000000e+00> : vector<8x128xf32>
    %10 = tpu.matmul %8, %9, %cst_8 {dimension_numbers = #tpu.dot_dimension_numbers<[1], [0], [0], [1], [0, 0, 1, 1], [], []>} : vector<8x128xbf16>, vector<128x128xbf16>, vector<8x128xf32> -> vector<8x128xf32>
    %c0_9 = arith.constant 0 : index
    %c0_10 = arith.constant 0 : index
    %11 = vector.load %arg5[%c0_9, %c0_10] : memref<1x128xf32, #tpu.memory_space<vmem>>, vector<1x128xf32>
    %12 = vector.broadcast %11 : vector<1x128xf32> to vector<8x128xf32>
    %13 = arith.addf %10, %12 : vector<8x128xf32>
    %cst_11 = arith.constant 0.000000e+00 : f32
    %14 = vector.broadcast %cst_11 : f32 to vector<8x128xf32>
    %15 = arith.maximumf %13, %14 : vector<8x128xf32>
    %16 = arith.truncf %15 : vector<8x128xf32> to vector<8x128xbf16>
    %c0_12 = arith.constant 0 : index
    %c0_13 = arith.constant 0 : index
    %17 = vector.load %arg6[%c0_12, %c0_13] : memref<128x128xbf16, #tpu.memory_space<vmem>>, vector<128x128xbf16>
    %cst_14 = arith.constant dense<0.000000e+00> : vector<8x128xf32>
    %18 = tpu.matmul %16, %17, %cst_14 {dimension_numbers = #tpu.dot_dimension_numbers<[1], [0], [0], [1], [0, 0, 1, 1], [], []>} : vector<8x128xbf16>, vector<128x128xbf16>, vector<8x128xf32> -> vector<8x128xf32>
    %c0_15 = arith.constant 0 : index
    %c0_16 = arith.constant 0 : index
    %19 = vector.load %arg7[%c0_15, %c0_16] : memref<1x128xf32, #tpu.memory_space<vmem>>, vector<1x128xf32>
    %20 = vector.broadcast %19 : vector<1x128xf32> to vector<8x128xf32>
    %21 = arith.addf %18, %20 : vector<8x128xf32>
    %c0_17 = arith.constant 0 : index
    %c0_18 = arith.constant 0 : index
    %22 = vector.load %arg8[%c0_17, %c0_18] : memref<8x128xf32, #tpu.memory_space<vmem>>, vector<8x128xf32>
    tpu.vector_store %arg8[%c0_17, %c0_18], %21 {strides = array<i32>} : memref<8x128xf32, #tpu.memory_space<vmem>>, vector<8x128xf32>,
    return
  }
  func.func @transform_0(%arg0: i32) -> (i32, i32) {
    %c0_i32 = arith.constant 0 : i32
    %c0_i32_0 = arith.constant 0 : i32
    return %arg0, %c0_i32 : i32, i32
  }
  func.func @transform_1(%arg0: i32) -> (i32, i32) {
    %c0_i32 = arith.constant 0 : i32
    %c0_i32_0 = arith.constant 0 : i32
    %c0_i32_1 = arith.constant 0 : i32
    return %c0_i32, %c0_i32_0 : i32, i32
  }
  func.func @transform_2(%arg0: i32) -> (i32, i32) {
    %c0_i32 = arith.constant 0 : i32
    %c0_i32_0 = arith.constant 0 : i32
    %c0_i32_1 = arith.constant 0 : i32
    return %c0_i32, %c0_i32_0 : i32, i32
  }
  func.func @transform_3(%arg0: i32) -> (i32, i32) {
    %c0_i32 = arith.constant 0 : i32
    %c0_i32_0 = arith.constant 0 : i32
    %c0_i32_1 = arith.constant 0 : i32
    return %c0_i32, %c0_i32_0 : i32, i32
  }
  func.func @transform_4(%arg0: i32) -> (i32, i32) {
    %c0_i32 = arith.constant 0 : i32
    %c0_i32_0 = arith.constant 0 : i32
    %c0_i32_1 = arith.constant 0 : i32
    return %c0_i32, %c0_i32_0 : i32, i32
  }
  func.func @transform_5(%arg0: i32) -> (i32, i32) {
    %c0_i32 = arith.constant 0 : i32
    %c0_i32_0 = arith.constant 0 : i32
    %c0_i32_1 = arith.constant 0 : i32
    return %c0_i32, %c0_i32_0 : i32, i32
  }
  func.func @transform_6(%arg0: i32) -> (i32, i32) {
    %c0_i32 = arith.constant 0 : i32
    %c0_i32_0 = arith.constant 0 : i32
    %c0_i32_1 = arith.constant 0 : i32
    return %c0_i32, %c0_i32_0 : i32, i32
  }
  func.func @transform_7(%arg0: i32) -> (i32, i32) {
    %c0_i32 = arith.constant 0 : i32
    %c0_i32_0 = arith.constant 0 : i32
    return %arg0, %c0_i32 : i32, i32
  }
}

module attributes {stable_mosaic.version = 11 : i64} {
  func.func @kernel(%arg0: i32, %arg1: memref<8x128xbf16, #tpu.memory_space<vmem>>, %arg2: memref<128x128xbf16, #tpu.memory_space<vmem>>, %arg3: memref<1x128xf32, #tpu.memory_space<vmem>>, %arg4: memref<128x128xbf16, #tpu.memory_space<vmem>>, %arg5: memref<1x128xf32, #tpu.memory_space<vmem>>, %arg6: memref<128x128xbf16, #tpu.memory_space<vmem>>, %arg7: memref<1x128xf32, #tpu.memory_space<vmem>>, %arg8: memref<8x128xf32, #tpu.memory_space<vmem>>) attributes {dimension_semantics = [#tpu.dimension_semantics<parallel>], iteration_bounds = array<i64: 1>, scalar_prefetch = 0 : i64, scratch_operands = 0 : i64, tpu.core_type = #tpu.core_type<tc>, window_params = [{transform_indices = @transform_0, window_bounds = array<i64: 8, 128>}, {pipeline_mode = #tpu.pipeline_mode<synchronous>, transform_indices = @transform_1, window_bounds = array<i64: 128, 128>}, {pipeline_mode = #tpu.pipeline_mode<synchronous>, transform_indices = @transform_2, window_bounds = array<i64: 1, 128>}, {pipeline_mode = #tpu.pipeline_mode<synchronous>, transform_indices = @transform_3, window_bounds = array<i64: 128, 128>}, {pipeline_mode = #tpu.pipeline_mode<synchronous>, transform_indices = @transform_4, window_bounds = array<i64: 1, 128>}, {pipeline_mode = #tpu.pipeline_mode<synchronous>, transform_indices = @transform_5, window_bounds = array<i64: 128, 128>}, {pipeline_mode = #tpu.pipeline_mode<synchronous>, transform_indices = @transform_6, window_bounds = array<i64: 1, 128>}, {transform_indices = @transform_7, window_bounds = array<i64: 8, 128>}]} {
    %c0 = arith.constant 0 : index
    %c0_0 = arith.constant 0 : index
    %0 = vector.load %arg1[%c0, %c0_0] : memref<8x128xbf16, #tpu.memory_space<vmem>>, vector<8x128xbf16>
    %c0_1 = arith.constant 0 : index
    %c0_2 = arith.constant 0 : index
    %1 = vector.load %arg2[%c0_1, %c0_2] : memref<128x128xbf16, #tpu.memory_space<vmem>>, vector<128x128xbf16>
    %cst = arith.constant dense<0.000000e+00> : vector<8x128xf32>
    %2 = tpu.matmul %0, %1, %cst {dimension_numbers = #tpu.dot_dimension_numbers<[1], [0], [0], [1], [0, 0, 1, 1], [], []>} : vector<8x128xbf16>, vector<128x128xbf16>, vector<8x128xf32> -> vector<8x128xf32>
    %c0_3 = arith.constant 0 : index
    %c0_4 = arith.constant 0 : index
    %3 = vector.load %arg3[%c0_3, %c0_4] : memref<1x128xf32, #tpu.memory_space<vmem>>, vector<1x128xf32>
    %4 = vector.broadcast %3 : vector<1x128xf32> to vector<8x128xf32>
    %5 = arith.addf %2, %4 : vector<8x128xf32>
    %cst_5 = arith.constant 0.000000e+00 : f32
    %6 = vector.broadcast %cst_5 : f32 to vector<8x128xf32>
    %7 = arith.maximumf %5, %6 : vector<8x128xf32>
    %8 = arith.truncf %7 : vector<8x128xf32> to vector<8x128xbf16>
    %c0_6 = arith.constant 0 : index
    %c0_7 = arith.constant 0 : index
    %9 = vector.load %arg4[%c0_6, %c0_7] : memref<128x128xbf16, #tpu.memory_space<vmem>>, vector<128x128xbf16>
    %cst_8 = arith.constant dense<0.000000e+00> : vector<8x128xf32>
    %10 = tpu.matmul %8, %9, %cst_8 {dimension_numbers = #tpu.dot_dimension_numbers<[1], [0], [0], [1], [0, 0, 1, 1], [], []>} : vector<8x128xbf16>, vector<128x128xbf16>, vector<8x128xf32> -> vector<8x128xf32>
    %c0_9 = arith.constant 0 : index
    %c0_10 = arith.constant 0 : index
    %11 = vector.load %arg5[%c0_9, %c0_10] : memref<1x128xf32, #tpu.memory_space<vmem>>, vector<1x128xf32>
    %12 = vector.broadcast %11 : vector<1x128xf32> to vector<8x128xf32>
    %13 = arith.addf %10, %12 : vector<8x128xf32>
    %cst_11 = arith.constant 0.000000e+00 : f32
    %14 = vector.broadcast %cst_11 : f32 to vector<8x128xf32>
    %15 = arith.maximumf %13, %14 : vector<8x128xf32>
    %16 = arith.truncf %15 : vector<8x128xf32> to vector<8x128xbf16>
    %c0_12 = arith.constant 0 : index
    %c0_13 = arith.constant 0 : index
    %17 = vector.load %arg6[%c0_12, %c0_13] : memref<128x128xbf16, #tpu.memory_space<vmem>>, vector<128x128xbf16>
    %cst_14 = arith.constant dense<0.000000e+00> : vector<8x128xf32>
    %18 = tpu.matmul %16, %17, %cst_14 {dimension_numbers = #tpu.dot_dimension_numbers<[1], [0], [0], [1], [0, 0, 1, 1], [], []>} : vector<8x128xbf16>, vector<128x128xbf16>, vector<8x128xf32> -> vector<8x128xf32>
    %c0_15 = arith.constant 0 : index
    %c0_16 = arith.constant 0 : index
    %19 = vector.load %arg7[%c0_15, %c0_16] : memref<1x128xf32, #tpu.memory_space<vmem>>, vector<1x128xf32>
    %20 = vector.broadcast %19 : vector<1x128xf32> to vector<8x128xf32>
    %21 = arith.addf %18, %20 : vector<8x128xf32>
    %c0_17 = arith.constant 0 : index
    %c0_18 = arith.constant 0 : index
    %22 = vector.load %arg8[%c0_17, %c0_18] : memref<8x128xf32, #tpu.memory_space<vmem>>, vector<8x128xf32>
    tpu.vector_store %arg8[%c0_17, %c0_18], %21 {strides = array<i32>} : memref<8x128xf32, #tpu.memory_space<vmem>>, vector<8x128xf32>,
    return
  }
  func.func @transform_0(%arg0: i32) -> (i32, i32) {
    %c0_i32 = arith.constant 0 : i32
    %c0_i32_0 = arith.constant 0 : i32
    return %arg0, %c0_i32 : i32, i32
  }
  func.func @transform_1(%arg0: i32) -> (i32, i32) {
    %c0_i32 = arith.constant 0 : i32
    %c0_i32_0 = arith.constant 0 : i32
    %c0_i32_1 = arith.constant 0 : i32
    return %c0_i32, %c0_i32_0 : i32, i32
  }
  func.func @transform_2(%arg0: i32) -> (i32, i32) {
    %c0_i32 = arith.constant 0 : i32
    %c0_i32_0 = arith.constant 0 : i32
    %c0_i32_1 = arith.constant 0 : i32
    return %c0_i32, %c0_i32_0 : i32, i32
  }
  func.func @transform_3(%arg0: i32) -> (i32, i32) {
    %c0_i32 = arith.constant 0 : i32
    %c0_i32_0 = arith.constant 0 : i32
    %c0_i32_1 = arith.constant 0 : i32
    return %c0_i32, %c0_i32_0 : i32, i32
  }
  func.func @transform_4(%arg0: i32) -> (i32, i32) {
    %c0_i32 = arith.constant 0 : i32
    %c0_i32_0 = arith.constant 0 : i32
    %c0_i32_1 = arith.constant 0 : i32
    return %c0_i32, %c0_i32_0 : i32, i32
  }
  func.func @transform_5(%arg0: i32) -> (i32, i32) {
    %c0_i32 = arith.constant 0 : i32
    %c0_i32_0 = arith.constant 0 : i32
    %c0_i32_1 = arith.constant 0 : i32
    return %c0_i32, %c0_i32_0 : i32, i32
  }
  func.func @transform_6(%arg0: i32) -> (i32, i32) {
    %c0_i32 = arith.constant 0 : i32
    %c0_i32_0 = arith.constant 0 : i32
    %c0_i32_1 = arith.constant 0 : i32
    return %c0_i32, %c0_i32_0 : i32, i32
  }
  func.func @transform_7(%arg0: i32) -> (i32, i32) {
    %c0_i32 = arith.constant 0 : i32
    %c0_i32_0 = arith.constant 0 : i32
    return %arg0, %c0_i32 : i32, i32
  }
}

</mosaic_0001>

<bundles_post_ra>
// kernel: projection_head_forward.1
= control target key start
LH: loop header
LB: loop body
LE: loop exit
PB: predicated region body
PF: predicated region fallthrough
CT: control target
= control target key end

     0   :  { %12 = vsyncpa [#allocation3], 0  ;;  %s758_s0 = inlined_call_operand.vmem [shape: bf16[8,128], index: 0, kind: input, shape index: {}]   ;;  %s759_s1 = inlined_call_operand.hbm [shape: bf16[128,128], index: 1, kind: input, shape index: {}]   ;;  %s760_s2 = inlined_call_operand.vmem [shape: f32[1,128], index: 2, kind: input, shape index: {}]   ;;  %s761_s3 = inlined_call_operand.hbm [shape: bf16[128,128], index: 3, kind: input, shape index: {}]   ;;  %s762_s4 = inlined_call_operand.vmem [shape: f32[1,128], index: 4, kind: input, shape index: {}]   ;;  %s763_s5 = inlined_call_operand.hbm [shape: bf16[128,128], index: 5, kind: input, shape index: {}]   ;;  %s764_s6 = inlined_call_operand.vmem [shape: f32[1,128], index: 6, kind: input, shape index: {}]   ;;  %s765_s7 = inlined_call_operand.hbm [shape: f32[8,128], index: 7, kind: output, shape index: {}]  }
   0x1   :  { %13 = vsyncpa [#allocation6], 0 }
   0x2   :  { %14 = vsyncpa [#allocation4], 0  ;;  %s656_s24 = smov [#allocation5]   ;;  %s657_s26 = smov [#allocation2]  }
   0x3   :  { %s36_s25 = sshll.u32 %s656_s24, 4  ;;  %s22_s27 = sshll.u32 %s657_s26, 4  ;;  %s37_s25 = int_to_ptr.vmem [resolvable:$true] %s36_s25  ;;  %s23_s27 = int_to_ptr.vmem [resolvable:$true] %s22_s27 }
   0x4   :  { %s578_s28 = scalar_lea.vmem %s37_s25, 1024  ;;  %p583_p1 = scmp.lt.s32.totalorder %s37_s25, %s37_s25 }
   0x5   :  { %p579_p0 = scmp.ne.s32.totalorder %s37_s25, %s578_s28  ;;  %p584_p2 = scmp.lt.s32.totalorder %s578_s28, %s578_s28 }
   0x7   :  { %p585_p3 = por %p584_p2, %p583_p1 }
   0x9   :  { %p586_p4 = pnand %p585_p3, %p579_p0 }
   0xb   :  { %589 = shalt.err (!%p586_p4)
}
   0xc   :  { %s658_s29 = smov 64   ;;  %s659_s30 = smov 4  }
   0xd   :  { %42 = dma.hbm_to_vmem [thread:$0]  %s761_s3, 1024, %s37_s25, [#allocation6], %s658_s29, %s658_s29, %s659_s30  }
   0xe   :  { %s598_s10 = scalar_lea.vmem %s23_s27, 1024  ;;  %p603_p6 = scmp.lt.s32.totalorder %s23_s27, %s23_s27 }
   0xf   :  { %p599_p5 = scmp.ne.s32.totalorder %s23_s27, %s598_s10  ;;  %p604_p7 = scmp.lt.s32.totalorder %s598_s10, %s598_s10 }
  0x11   :  { %p605_p8 = por %p604_p7, %p603_p6 }
  0x13   :  { %p606_p9 = pnand %p605_p8, %p599_p5 }
  0x15   :  { %609 = shalt.err (!%p606_p9)
}
  0x16   :  { %28 = dma.hbm_to_vmem [thread:$0]  %s759_s1, 1024, %s23_s27, [#allocation3], %s658_s29, %s658_s29, %s659_s30  }
  0x17   :  { %s660_s13 = smov [#allocation7]  }
  0x18   :  { %s50_s14 = sshll.u32 %s660_s13, 4  ;;  %s51_s14 = int_to_ptr.vmem [resolvable:$true] %s50_s14 }
  0x19   :  { %s618_s15 = scalar_lea.vmem %s51_s14, 1024  ;;  %p623_p11 = scmp.lt.s32.totalorder %s51_s14, %s51_s14 }
  0x1a   :  { %p619_p10 = scmp.ne.s32.totalorder %s51_s14, %s618_s15  ;;  %p624_p12 = scmp.lt.s32.totalorder %s618_s15, %s618_s15 }
  0x1c   :  { %p625_p13 = por %p624_p12, %p623_p11 }
  0x1e   :  { %p626_p0 = pnand %p625_p13, %p619_p10 }
  0x20   :  { %629 = shalt.err (!%p626_p0)
}
  0x21   :  { %56 = dma.hbm_to_vmem [thread:$0]  %s763_s5, 1024, %s51_s14, [#allocation6], %s658_s29, %s658_s29, %s659_s30  }
  0x22   :  { %650 = dma.done.wait [#allocation3], 1024  }
  0x23   :  { %651 = vsyncadd [#allocation3], 4294966272 }
  0x24   :  { %652 = dma.done.wait [#allocation6], 2048  }
  0x25   :  { %653 = vsyncadd [#allocation6], 4294965248  ;;  %v661_v0 = vmov 0.0   ;;  %vm662_vm0 = vmmov 0   ;;  %v546_v1 = vld [vmem:[#allocation2 + $0x38] sm:$0xff]   ;;  %v547_v2 = vld [vmem:[#allocation2 + $0x30] sm:$0xff]  }
  0x26   :  { %478 = vmatprep.subr.bf16.mxu0 %v661_v0  ;;  %494 = vmatprep.mubr.msk.bf16.mxu0 %vm662_vm0, %v661_v0  ;;  %v548_v3 = vld [vmem:[#allocation2 + $0x28] sm:$0xff]   ;;  %v554_v4 = vld [vmem:[#allocation5 + $0x38] sm:$0xff]   ;;  %v549_v5 = vld [vmem:[#allocation2 + $0x20] sm:$0xff]   ;;  %s663_s21 = smov [#allocation8]  }
  0x27   :  { %498 = vmatprep.subr.bf16.mxu1 %v661_v0  ;;  %514 = vmatprep.mubr.msk.bf16.mxu1 %vm662_vm0, %v661_v0  ;;  %v555_v6 = vld [vmem:[#allocation5 + $0x30] sm:$0xff]   ;;  %v550_v7 = vld [vmem:[#allocation2 + $0x18] sm:$0xff]   ;;  %v556_v8 = vld [vmem:[#allocation5 + $0x28] sm:$0xff]   ;;  %s414_s22 = sshll.u32 %s663_s21, 4  ;;  %s415_s22 = int_to_ptr.vmem [resolvable:$true] %s414_s22 }
  0x28   :  { %479 = vmatpush3.bf16.msra.mxu0 %v546_v1  ;;  %499 = vmatpush3.bf16.msra.mxu1 %v554_v4  ;;  %v551_v9 = vld [vmem:[#allocation2 + $0x10] sm:$0xff]   ;;  %v557_v10 = vld [vmem:[#allocation5 + $0x20] sm:$0xff]   ;;  %v552_v11 = vld [vmem:[#allocation2 + $0x8] sm:$0xff]   ;;  %p635_p2 = scmp.lt.s32.totalorder %s415_s22, %s415_s22 }
  0x29   :  { %480 = vmatprep.subr.bf16.mxu0 %v661_v0  ;;  %500 = vmatprep.subr.bf16.mxu1 %v661_v0  ;;  %v558_v12 = vld [vmem:[#allocation5 + $0x18] sm:$0xff]   ;;  %v553_v13 = vld [vmem:[#allocation2] sm:$0xff]   ;;  %v559_v14 = vld [vmem:[#allocation5 + $0x10] sm:$0xff]  }
  0x2a   :  { %v69_v15 = vld [vmem:[%s758_s0] sm:$0xf]  ;;  %v560_v16 = vld [vmem:[#allocation5 + $0x8] sm:$0xff]   ;;  %v562_v18 = vld [vmem:[#allocation7 + $0x38] sm:$0xff]  }
  0x2b   :  { %v561_v17 = vld [vmem:[#allocation5] sm:$0xff]   ;;  %v563_v19 = vld [vmem:[#allocation7 + $0x30] sm:$0xff]   ;;  %v564_v20 = vld [vmem:[#allocation7 + $0x28] sm:$0xff]  }
  0x2c   :  { %481 = vmatpush3.bf16.msra.mxu0 %v547_v2  ;;  %501 = vmatpush3.bf16.msra.mxu1 %v555_v6  ;;  %v565_v21 = vld [vmem:[#allocation7 + $0x20] sm:$0xff]   ;;  %v566_v22 = vld [vmem:[#allocation7 + $0x18] sm:$0xff]   ;;  %v567_v23 = vld [vmem:[#allocation7 + $0x10] sm:$0xff]  }
  0x2d   :  { %482 = vmatprep.subr.bf16.mxu0 %v661_v0  ;;  %502 = vmatprep.subr.bf16.mxu1 %v661_v0  ;;  %v424_v24 = vld [vmem:[%s760_s2] ss:$0 sm:$0xff]  ;;  %v568_v32 = vld [vmem:[#allocation7 + $0x8] sm:$0xff]  }
  0x2e   :  { %v569_v33 = vld [vmem:[#allocation7] sm:$0xff]  }
  0x2f   :  { %v433_v34 = vld [vmem:[%s762_s4] ss:$0 sm:$0xff]  ;;  %s630_s4 = scalar_lea.vmem %s415_s22, 128 }
  0x30   :  { %483 = vmatpush3.bf16.msra.mxu0 %v548_v3  ;;  %503 = vmatpush3.bf16.msra.mxu1 %v556_v8  ;;  %v442_v42 = vld [vmem:[%s764_s6] ss:$0 sm:$0xff]  ;;  %p631_p1 = scmp.ne.s32.totalorder %s415_s22, %s630_s4  ;;  %p636_p3 = scmp.lt.s32.totalorder %s630_s4, %s630_s4 }
  0x31   :  { %484 = vmatprep.subr.bf16.mxu0 %v661_v0  ;;  %504 = vmatprep.subr.bf16.mxu1 %v661_v0 }
  0x32   :  { %p637_p4 = por %p636_p3, %p635_p2 }
  0x34   :  { %485 = vmatpush3.bf16.msra.mxu0 %v549_v5  ;;  %505 = vmatpush3.bf16.msra.mxu1 %v557_v10  ;;  %p638_p5 = pnand %p637_p4, %p631_p1 }
  0x35   :  { %486 = vmatprep.subr.bf16.mxu0 %v661_v0  ;;  %506 = vmatprep.subr.bf16.mxu1 %v661_v0 }
  0x38   :  { %487 = vmatpush3.bf16.msra.mxu0 %v550_v7  ;;  %507 = vmatpush3.bf16.msra.mxu1 %v558_v12 }
  0x39   :  { %488 = vmatprep.subr.bf16.mxu0 %v661_v0  ;;  %508 = vmatprep.subr.bf16.mxu1 %v661_v0 }
  0x3c   :  { %489 = vmatpush3.bf16.msra.mxu0 %v551_v9  ;;  %509 = vmatpush3.bf16.msra.mxu1 %v559_v14 }
  0x3d   :  { %490 = vmatprep.subr.bf16.mxu0 %v661_v0  ;;  %510 = vmatprep.subr.bf16.mxu1 %v661_v0 }
  0x40   :  { %491 = vmatpush3.bf16.msra.mxu0 %v552_v11  ;;  %511 = vmatpush3.bf16.msra.mxu1 %v560_v16 }
  0x41   :  { %492 = vmatprep.subr.bf16.mxu0 %v661_v0  ;;  %512 = vmatprep.subr.bf16.mxu1 %v661_v0 }
  0x44   :  { %493 = vmatpush3.bf16.msra.mxu0 %v553_v13  ;;  %513 = vmatpush3.bf16.msra.mxu1 %v561_v17 }
  0x45   :  { %518 = vmatprep.subr.bf16.mxu0 %v661_v0 }
  0x47   :  { %495 = vmatmul.mubr.bf16.vlgmr.msra.gmra.mxu0 %v69_v15 }
  0x48   :  { %534 = vmatprep.mubr.msk.bf16.mxu0 %vm662_vm0, %v661_v0  ;;  %519 = vmatpush3.bf16.msra.mxu0 %v562_v18 }
  0x49   :  { %520 = vmatprep.subr.bf16.mxu0 %v661_v0 }
  0x4c   :  { %521 = vmatpush3.bf16.msra.mxu0 %v563_v19 }
  0x4d   :  { %522 = vmatprep.subr.bf16.mxu0 %v661_v0 }
  0x50   :  { %523 = vmatpush3.bf16.msra.mxu0 %v564_v20 }
  0x51   :  { %524 = vmatprep.subr.bf16.mxu0 %v661_v0 }
  0x54   :  { %525 = vmatpush3.bf16.msra.mxu0 %v565_v21 }
  0x55   :  { %526 = vmatprep.subr.bf16.mxu0 %v661_v0 }
  0x58   :  { %527 = vmatpush3.bf16.msra.mxu0 %v566_v22 }
  0x59   :  { %528 = vmatprep.subr.bf16.mxu0 %v661_v0 }
  0x5c   :  { %529 = vmatpush3.bf16.msra.mxu0 %v567_v23 }
  0x5d   :  { %530 = vmatprep.subr.bf16.mxu0 %v661_v0 }
  0x60   :  { %531 = vmatpush3.bf16.msra.mxu0 %v568_v32 }
  0x61   :  { %532 = vmatprep.subr.bf16.mxu0 %v661_v0 }
  0x64   :  { %533 = vmatpush3.bf16.msra.mxu0 %v569_v33 }
 0x107   :  { %v175_v25 = vpop.f32.mrf.mxu0 }
 0x108   :  { %v176_v26 = vadd.f32 %v424_v24, %v175_v25 }
 0x109   :  { %v496_v27 = vpop.f32.mrf.mxu0 }
 0x10a   :  { %v181_v28 = vmax.f32 %v176_v26, 0.0 }
 0x10b   :  { %v178_v29 = vpop.f32.mrf.mxu0 }
 0x10c   :  { %v182_v30 = vpack.c.bf16 %v181_v28, %v181_v28 }
 0x10d   :  { %v497_v31 = vpop.f32.mrf.mxu0 }
 0x10e   :  { %515 = vmatmul.mubr.bf16.vlgmr.msra.gmra.mxu1 %v182_v30 }
 0x1ce   :  { %v288_v35 = vpop.f32.mrf.mxu1 }
 0x1cf   :  { %v289_v36 = vadd.f32 %v433_v34, %v288_v35 }
 0x1d0   :  { %v516_v37 = vpop.f32.mrf.mxu1 }
 0x1d1   :  { %v294_v38 = vmax.f32 %v289_v36, 0.0 }
 0x1d2   :  { %v291_v39 = vpop.f32.mrf.mxu1 }
 0x1d3   :  { %v295_v40 = vpack.c.bf16 %v294_v38, %v294_v38 }
 0x1d4   :  { %v517_v41 = vpop.f32.mrf.mxu1 }
 0x1d5   :  { %535 = vmatmul.mubr.bf16.vlgmr.msra.gmra.mxu0 %v295_v40 }
 0x295   :  { %v401_v43 = vpop.f32.mrf.mxu0 }
 0x296   :  { %v402_v44 = vadd.f32 %v442_v42, %v401_v43 }
 0x297   :  { %v536_v45 = vpop.f32.mrf.mxu0 }
 0x298   :  { %407 = vst [vmem:[#allocation8] sm:$0xff] %v402_v44 }
 0x299   :  { %v404_v46 = vpop.f32.mrf.mxu0 }
 0x29a   :  { %641 = shalt.err (!%p638_p5)
}
 0x29b   :  { %417 = dma.vmem_to_hbm [thread:$0]  %s415_s22, 128, %s765_s7, [#allocation4]   ;;  %v537_v47 = vpop.f32.mrf.mxu0 }
 0x29c   :  { %654 = dma.done.wait [#allocation4], 128  }
 0x29d   :  { %655 = vsyncadd [#allocation4], 4294967168 }
 0x29e   :  { %421 = vsyncpa [#allocation3], 1 }
 0x29f   :  { %422 = vsyncpa [#allocation6], 1 }
 0x2a0   :  { %423 = vsyncpa [#allocation4], 1 }

// kernel: projection_head_forward.1
= control target key start
LH: loop header
LB: loop body
LE: loop exit
PB: predicated region body
PF: predicated region fallthrough
CT: control target
= control target key end

     0   :  { %12 = vsyncpa [#allocation3], 0  ;;  %s758_s0 = inlined_call_operand.vmem [shape: bf16[8,128], index: 0, kind: input, shape index: {}]   ;;  %s759_s1 = inlined_call_operand.hbm [shape: bf16[128,128], index: 1, kind: input, shape index: {}]   ;;  %s760_s2 = inlined_call_operand.vmem [shape: f32[1,128], index: 2, kind: input, shape index: {}]   ;;  %s761_s3 = inlined_call_operand.hbm [shape: bf16[128,128], index: 3, kind: input, shape index: {}]   ;;  %s762_s4 = inlined_call_operand.vmem [shape: f32[1,128], index: 4, kind: input, shape index: {}]   ;;  %s763_s5 = inlined_call_operand.hbm [shape: bf16[128,128], index: 5, kind: input, shape index: {}]   ;;  %s764_s6 = inlined_call_operand.vmem [shape: f32[1,128], index: 6, kind: input, shape index: {}]   ;;  %s765_s7 = inlined_call_operand.hbm [shape: f32[8,128], index: 7, kind: output, shape index: {}]  }
   0x1   :  { %13 = vsyncpa [#allocation6], 0 }
   0x2   :  { %14 = vsyncpa [#allocation4], 0  ;;  %s656_s24 = smov [#allocation5]   ;;  %s657_s26 = smov [#allocation2]  }
   0x3   :  { %s36_s25 = sshll.u32 %s656_s24, 4  ;;  %s22_s27 = sshll.u32 %s657_s26, 4  ;;  %s37_s25 = int_to_ptr.vmem [resolvable:$true] %s36_s25  ;;  %s23_s27 = int_to_ptr.vmem [resolvable:$true] %s22_s27 }
   0x4   :  { %s578_s28 = scalar_lea.vmem %s37_s25, 1024  ;;  %p583_p1 = scmp.lt.s32.totalorder %s37_s25, %s37_s25 }
   0x5   :  { %p579_p0 = scmp.ne.s32.totalorder %s37_s25, %s578_s28  ;;  %p584_p2 = scmp.lt.s32.totalorder %s578_s28, %s578_s28 }
   0x7   :  { %p585_p3 = por %p584_p2, %p583_p1 }
   0x9   :  { %p586_p4 = pnand %p585_p3, %p579_p0 }
   0xb   :  { %589 = shalt.err (!%p586_p4)
}
   0xc   :  { %s658_s29 = smov 64   ;;  %s659_s30 = smov 4  }
   0xd   :  { %42 = dma.hbm_to_vmem [thread:$0]  %s761_s3, 1024, %s37_s25, [#allocation6], %s658_s29, %s658_s29, %s659_s30  }
   0xe   :  { %s598_s10 = scalar_lea.vmem %s23_s27, 1024  ;;  %p603_p6 = scmp.lt.s32.totalorder %s23_s27, %s23_s27 }
   0xf   :  { %p599_p5 = scmp.ne.s32.totalorder %s23_s27, %s598_s10  ;;  %p604_p7 = scmp.lt.s32.totalorder %s598_s10, %s598_s10 }
  0x11   :  { %p605_p8 = por %p604_p7, %p603_p6 }
  0x13   :  { %p606_p9 = pnand %p605_p8, %p599_p5 }
  0x15   :  { %609 = shalt.err (!%p606_p9)
}
  0x16   :  { %28 = dma.hbm_to_vmem [thread:$0]  %s759_s1, 1024, %s23_s27, [#allocation3], %s658_s29, %s658_s29, %s659_s30  }
  0x17   :  { %s660_s13 = smov [#allocation7]  }
  0x18   :  { %s50_s14 = sshll.u32 %s660_s13, 4  ;;  %s51_s14 = int_to_ptr.vmem [resolvable:$true] %s50_s14 }
  0x19   :  { %s618_s15 = scalar_lea.vmem %s51_s14, 1024  ;;  %p623_p11 = scmp.lt.s32.totalorder %s51_s14, %s51_s14 }
  0x1a   :  { %p619_p10 = scmp.ne.s32.totalorder %s51_s14, %s618_s15  ;;  %p624_p12 = scmp.lt.s32.totalorder %s618_s15, %s618_s15 }
  0x1c   :  { %p625_p13 = por %p624_p12, %p623_p11 }
  0x1e   :  { %p626_p0 = pnand %p625_p13, %p619_p10 }
  0x20   :  { %629 = shalt.err (!%p626_p0)
}
  0x21   :  { %56 = dma.hbm_to_vmem [thread:$0]  %s763_s5, 1024, %s51_s14, [#allocation6], %s658_s29, %s658_s29, %s659_s30  }
  0x22   :  { %650 = dma.done.wait [#allocation3], 1024  }
  0x23   :  { %651 = vsyncadd [#allocation3], 4294966272 }
  0x24   :  { %652 = dma.done.wait [#allocation6], 2048  }
  0x25   :  { %653 = vsyncadd [#allocation6], 4294965248  ;;  %v661_v0 = vmov 0.0   ;;  %vm662_vm0 = vmmov 0   ;;  %v546_v1 = vld [vmem:[#allocation2 + $0x38] sm:$0xff]   ;;  %v547_v2 = vld [vmem:[#allocation2 + $0x30] sm:$0xff]  }
  0x26   :  { %478 = vmatprep.subr.bf16.mxu0 %v661_v0  ;;  %494 = vmatprep.mubr.msk.bf16.mxu0 %vm662_vm0, %v661_v0  ;;  %v548_v3 = vld [vmem:[#allocation2 + $0x28] sm:$0xff]   ;;  %v554_v4 = vld [vmem:[#allocation5 + $0x38] sm:$0xff]   ;;  %v549_v5 = vld [vmem:[#allocation2 + $0x20] sm:$0xff]   ;;  %s663_s21 = smov [#allocation8]  }
  0x27   :  { %498 = vmatprep.subr.bf16.mxu1 %v661_v0  ;;  %514 = vmatprep.mubr.msk.bf16.mxu1 %vm662_vm0, %v661_v0  ;;  %v555_v6 = vld [vmem:[#allocation5 + $0x30] sm:$0xff]   ;;  %v550_v7 = vld [vmem:[#allocation2 + $0x18] sm:$0xff]   ;;  %v556_v8 = vld [vmem:[#allocation5 + $0x28] sm:$0xff]   ;;  %s414_s22 = sshll.u32 %s663_s21, 4  ;;  %s415_s22 = int_to_ptr.vmem [resolvable:$true] %s414_s22 }
  0x28   :  { %479 = vmatpush3.bf16.msra.mxu0 %v546_v1  ;;  %499 = vmatpush3.bf16.msra.mxu1 %v554_v4  ;;  %v551_v9 = vld [vmem:[#allocation2 + $0x10] sm:$0xff]   ;;  %v557_v10 = vld [vmem:[#allocation5 + $0x20] sm:$0xff]   ;;  %v552_v11 = vld [vmem:[#allocation2 + $0x8] sm:$0xff]   ;;  %p635_p2 = scmp.lt.s32.totalorder %s415_s22, %s415_s22 }
  0x29   :  { %480 = vmatprep.subr.bf16.mxu0 %v661_v0  ;;  %500 = vmatprep.subr.bf16.mxu1 %v661_v0  ;;  %v558_v12 = vld [vmem:[#allocation5 + $0x18] sm:$0xff]   ;;  %v553_v13 = vld [vmem:[#allocation2] sm:$0xff]   ;;  %v559_v14 = vld [vmem:[#allocation5 + $0x10] sm:$0xff]  }
  0x2a   :  { %v69_v15 = vld [vmem:[%s758_s0] sm:$0xf]  ;;  %v560_v16 = vld [vmem:[#allocation5 + $0x8] sm:$0xff]   ;;  %v562_v18 = vld [vmem:[#allocation7 + $0x38] sm:$0xff]  }
  0x2b   :  { %v561_v17 = vld [vmem:[#allocation5] sm:$0xff]   ;;  %v563_v19 = vld [vmem:[#allocation7 + $0x30] sm:$0xff]   ;;  %v564_v20 = vld [vmem:[#allocation7 + $0x28] sm:$0xff]  }
  0x2c   :  { %481 = vmatpush3.bf16.msra.mxu0 %v547_v2  ;;  %501 = vmatpush3.bf16.msra.mxu1 %v555_v6  ;;  %v565_v21 = vld [vmem:[#allocation7 + $0x20] sm:$0xff]   ;;  %v566_v22 = vld [vmem:[#allocation7 + $0x18] sm:$0xff]   ;;  %v567_v23 = vld [vmem:[#allocation7 + $0x10] sm:$0xff]  }
  0x2d   :  { %482 = vmatprep.subr.bf16.mxu0 %v661_v0  ;;  %502 = vmatprep.subr.bf16.mxu1 %v661_v0  ;;  %v424_v24 = vld [vmem:[%s760_s2] ss:$0 sm:$0xff]  ;;  %v568_v32 = vld [vmem:[#allocation7 + $0x8] sm:$0xff]  }
  0x2e   :  { %v569_v33 = vld [vmem:[#allocation7] sm:$0xff]  }
  0x2f   :  { %v433_v34 = vld [vmem:[%s762_s4] ss:$0 sm:$0xff]  ;;  %s630_s4 = scalar_lea.vmem %s415_s22, 128 }
  0x30   :  { %483 = vmatpush3.bf16.msra.mxu0 %v548_v3  ;;  %503 = vmatpush3.bf16.msra.mxu1 %v556_v8  ;;  %v442_v42 = vld [vmem:[%s764_s6] ss:$0 sm:$0xff]  ;;  %p631_p1 = scmp.ne.s32.totalorder %s415_s22, %s630_s4  ;;  %p636_p3 = scmp.lt.s32.totalorder %s630_s4, %s630_s4 }
  0x31   :  { %484 = vmatprep.subr.bf16.mxu0 %v661_v0  ;;  %504 = vmatprep.subr.bf16.mxu1 %v661_v0 }
  0x32   :  { %p637_p4 = por %p636_p3, %p635_p2 }
  0x34   :  { %485 = vmatpush3.bf16.msra.mxu0 %v549_v5  ;;  %505 = vmatpush3.bf16.msra.mxu1 %v557_v10  ;;  %p638_p5 = pnand %p637_p4, %p631_p1 }
  0x35   :  { %486 = vmatprep.subr.bf16.mxu0 %v661_v0  ;;  %506 = vmatprep.subr.bf16.mxu1 %v661_v0 }
  0x38   :  { %487 = vmatpush3.bf16.msra.mxu0 %v550_v7  ;;  %507 = vmatpush3.bf16.msra.mxu1 %v558_v12 }
  0x39   :  { %488 = vmatprep.subr.bf16.mxu0 %v661_v0  ;;  %508 = vmatprep.subr.bf16.mxu1 %v661_v0 }
  0x3c   :  { %489 = vmatpush3.bf16.msra.mxu0 %v551_v9  ;;  %509 = vmatpush3.bf16.msra.mxu1 %v559_v14 }
  0x3d   :  { %490 = vmatprep.subr.bf16.mxu0 %v661_v0  ;;  %510 = vmatprep.subr.bf16.mxu1 %v661_v0 }
  0x40   :  { %491 = vmatpush3.bf16.msra.mxu0 %v552_v11  ;;  %511 = vmatpush3.bf16.msra.mxu1 %v560_v16 }
  0x41   :  { %492 = vmatprep.subr.bf16.mxu0 %v661_v0  ;;  %512 = vmatprep.subr.bf16.mxu1 %v661_v0 }
  0x44   :  { %493 = vmatpush3.bf16.msra.mxu0 %v553_v13  ;;  %513 = vmatpush3.bf16.msra.mxu1 %v561_v17 }
  0x45   :  { %518 = vmatprep.subr.bf16.mxu0 %v661_v0 }
  0x47   :  { %495 = vmatmul.mubr.bf16.vlgmr.msra.gmra.mxu0 %v69_v15 }
  0x48   :  { %534 = vmatprep.mubr.msk.bf16.mxu0 %vm662_vm0, %v661_v0  ;;  %519 = vmatpush3.bf16.msra.mxu0 %v562_v18 }
  0x49   :  { %520 = vmatprep.subr.bf16.mxu0 %v661_v0 }
  0x4c   :  { %521 = vmatpush3.bf16.msra.mxu0 %v563_v19 }
  0x4d   :  { %522 = vmatprep.subr.bf16.mxu0 %v661_v0 }
  0x50   :  { %523 = vmatpush3.bf16.msra.mxu0 %v564_v20 }
  0x51   :  { %524 = vmatprep.subr.bf16.mxu0 %v661_v0 }
  0x54   :  { %525 = vmatpush3.bf16.msra.mxu0 %v565_v21 }
  0x55   :  { %526 = vmatprep.subr.bf16.mxu0 %v661_v0 }
  0x58   :  { %527 = vmatpush3.bf16.msra.mxu0 %v566_v22 }
  0x59   :  { %528 = vmatprep.subr.bf16.mxu0 %v661_v0 }
  0x5c   :  { %529 = vmatpush3.bf16.msra.mxu0 %v567_v23 }
  0x5d   :  { %530 = vmatprep.subr.bf16.mxu0 %v661_v0 }
  0x60   :  { %531 = vmatpush3.bf16.msra.mxu0 %v568_v32 }
  0x61   :  { %532 = vmatprep.subr.bf16.mxu0 %v661_v0 }
  0x64   :  { %533 = vmatpush3.bf16.msra.mxu0 %v569_v33 }
 0x107   :  { %v175_v25 = vpop.f32.mrf.mxu0 }
 0x108   :  { %v176_v26 = vadd.f32 %v424_v24, %v175_v25 }
 0x109   :  { %v496_v27 = vpop.f32.mrf.mxu0 }
 0x10a   :  { %v181_v28 = vmax.f32 %v176_v26, 0.0 }
 0x10b   :  { %v178_v29 = vpop.f32.mrf.mxu0 }
 0x10c   :  { %v182_v30 = vpack.c.bf16 %v181_v28, %v181_v28 }
 0x10d   :  { %v497_v31 = vpop.f32.mrf.mxu0 }
 0x10e   :  { %515 = vmatmul.mubr.bf16.vlgmr.msra.gmra.mxu1 %v182_v30 }
 0x1ce   :  { %v288_v35 = vpop.f32.mrf.mxu1 }
 0x1cf   :  { %v289_v36 = vadd.f32 %v433_v34, %v288_v35 }
 0x1d0   :  { %v516_v37 = vpop.f32.mrf.mxu1 }
 0x1d1   :  { %v294_v38 = vmax.f32 %v289_v36, 0.0 }
 0x1d2   :  { %v291_v39 = vpop.f32.mrf.mxu1 }
 0x1d3   :  { %v295_v40 = vpack.c.bf16 %v294_v38, %v294_v38 }
 0x1d4   :  { %v517_v41 = vpop.f32.mrf.mxu1 }
 0x1d5   :  { %535 = vmatmul.mubr.bf16.vlgmr.msra.gmra.mxu0 %v295_v40 }
 0x295   :  { %v401_v43 = vpop.f32.mrf.mxu0 }
 0x296   :  { %v402_v44 = vadd.f32 %v442_v42, %v401_v43 }
 0x297   :  { %v536_v45 = vpop.f32.mrf.mxu0 }
 0x298   :  { %407 = vst [vmem:[#allocation8] sm:$0xff] %v402_v44 }
 0x299   :  { %v404_v46 = vpop.f32.mrf.mxu0 }
 0x29a   :  { %641 = shalt.err (!%p638_p5)
}
 0x29b   :  { %417 = dma.vmem_to_hbm [thread:$0]  %s415_s22, 128, %s765_s7, [#allocation4]   ;;  %v537_v47 = vpop.f32.mrf.mxu0 }
 0x29c   :  { %654 = dma.done.wait [#allocation4], 128  }
 0x29d   :  { %655 = vsyncadd [#allocation4], 4294967168 }
 0x29e   :  { %421 = vsyncpa [#allocation3], 1 }
 0x29f   :  { %422 = vsyncpa [#allocation6], 1 }
 0x2a0   :  { %423 = vsyncpa [#allocation4], 1 }

</bundles_post_ra>
